<compile_context>
chip_gen: v5e
topology: v5e:2x2
jax: 0.10.0
libtpu: 0.0.40
codegen_flags: <defaults>
</compile_context>

<pallas_src>
import jax
import jax.numpy as jnp
from jax.experimental import pallas as pl
from jax.experimental.pallas import tpu as pltpu


def _quantizer_kernel(x_ref, o_ref):
    # TODO(synk): Quantizer.forward is abstract (raises NotImplementedError in
    # the reference); the base-class contract is a shape/dtype-preserving map.
    # When a concrete rule lands (abs-max scale, divide, round), fuse it here:
    # this copy is HBM-bound, so VPU/EUP work (pl.reciprocal(approx=True),
    # pltpu.stochastic_round) is essentially free under the DMA.
    o_ref[...] = x_ref[...]


def _sublane_min(dtype) -> int:
    """Minimum sublane count for a full vreg at this dtype width."""
    return {4: 8, 2: 16, 1: 32}.get(jnp.dtype(dtype).itemsize, 8)


def _vmem_capacity_bytes() -> int:
    """Per-core VMEM capacity; conservative (v7x) fallback if query fails."""
    try:
        cap = getattr(pltpu.get_tpu_info(), "vmem_capacity_bytes", None)
        if cap:
            return int(cap)
    except Exception:
        pass
    return 64 * 1024 * 1024


# Below this the whole array goes in one block (pipelining overhead > benefit).
_MIN_PIPELINE_BYTES = 1 << 20
# Ragged (n % 128 != 0) inputs up to this size use one full-extent block.
_RAGGED_SINGLE_BLOCK_BYTES = 512 << 10
# Minimum grid steps for pipelined inputs: DMA read/write overlap + >= 2 steps
# per TensorCore on v7x (2 TCs/chip).
_MIN_PIPELINE_STEPS = 4


def quantizer_forward(x: jax.Array, bit: int = 8) -> jax.Array:
    """Pallas 'forward' for the (abstract) Quantizer module.

    Args:
      x: input array, any shape (e.g. NCHW activations).
      bit: kept for API parity with Quantizer(bit); unused by the base class.
    Returns:
      Array with the same shape and dtype as x.
    """
    del bit  # base class does not use it

    orig_shape = x.shape
    dtype = x.dtype
    itemsize = jnp.dtype(dtype).itemsize
    n = x.size
    if n == 0:  # degenerate: nothing to move
        return x

    sub_min = _sublane_min(dtype)
    total_bytes = n * itemsize

    x_flat = jnp.ravel(x)
    needs_slice = False

    # ---- choose a lane-dense 2-D slab (rows, width) ----
    if n % 128 == 0:
        # Exact reshape: no pad, no tail slice -> no extra HBM passes.
        width = None
        for w in (4096, 2048, 1024, 512, 256, 128):
            if n % w == 0 and (n // w) % sub_min == 0:
                width = w
                break
        if width is None:
            for w in (4096, 2048, 1024, 512, 256, 128):
                if n % w == 0:
                    width = w
                    break
        rows = n // width
    elif total_bytes <= _RAGGED_SINGLE_BLOCK_BYTES:
        # Ragged but small: single full-extent block (exempt from the (8,128)
        # rule) -> still no pad and no slice.
        rows, width = 1, n
    else:
        # Large ragged (rare): minimal pad to the lane width, one trailing
        # slice restores the exact size.
        # TODO(synk): a fully pad/slice-free large-ragged path needs manual
        # DMA (memory_space=pl.ANY + pltpu.make_async_copy) for the tail.
        width = 128
        padded = -(-n // width) * width
        x_flat = jnp.pad(x_flat, (0, padded - n))
        rows = padded // width
        needs_slice = True

    x2d = x_flat.reshape(rows, width)

    # ---- VMEM-capacity-derived block sizing ----
    vmem_cap = _vmem_capacity_bytes()
    target_block_bytes = max(vmem_cap // 8, 2 * 1024 * 1024)      # 8 MiB v7x / 16 MiB v5e,v6e
    vmem_limit = min(4 * target_block_bytes + 8 * 1024 * 1024,    # 4x double-buffered + headroom
                     vmem_cap - 16 * 1024 * 1024)
    vmem_limit = max(vmem_limit, 32 * 1024 * 1024)

    if total_bytes <= _MIN_PIPELINE_BYTES or rows <= sub_min:
        # Small input: one full-extent block (per-step overhead dominates).
        tile_rows = rows
        grid = (1,)
    else:
        # Large input: never a single block.  Cap the tile so the grid has at
        # least _MIN_PIPELINE_STEPS steps -> read/write DMA overlap and both
        # v7x TensorCores get work; otherwise use ~VMEM/8-sized tiles.
        row_bytes = width * itemsize
        tile_rows = max((target_block_bytes // row_bytes) // sub_min * sub_min,
                        sub_min)
        step_cap = max((rows // _MIN_PIPELINE_STEPS) // sub_min * sub_min,
                       sub_min)
        tile_rows = min(tile_rows, step_cap, rows)
        grid = (pl.cdiv(rows, tile_rows),)  # partial last block handled by Pallas

    out2d = pl.pallas_call(
        _quantizer_kernel,
        out_shape=jax.ShapeDtypeStruct((rows, width), dtype),
        grid_spec=pltpu.PrefetchScalarGridSpec(
            num_scalar_prefetch=0,
            grid=grid,
            in_specs=[pl.BlockSpec((tile_rows, width), lambda i: (i, 0))],
            out_specs=pl.BlockSpec((tile_rows, width), lambda i: (i, 0)),
        ),
        # Reuse the (intermediate) flattened input buffer as the output; under
        # jit this removes the separate output allocation entirely.
        input_output_aliases={0: 0},
        compiler_params=pltpu.CompilerParams(
            dimension_semantics=("parallel",),
            vmem_limit_bytes=vmem_limit,
        ),
    )(x2d)

    if needs_slice:
        return out2d.reshape(-1)[:n].reshape(orig_shape)
    return out2d.reshape(orig_shape)


if __name__ == "__main__":
    key = jax.random.PRNGKey(0)
    k1, k2 = jax.random.split(key)

    # Small NCHW activation, consistent with a conv-style quantizer input.
    # 2*4*16*16 = 2048 elements -> exact lane-dense (8, 256) slab, one block.
    x_small = jax.random.normal(k1, (2, 4, 16, 16), dtype=jnp.float32)
    y_small = jax.block_until_ready(quantizer_forward(x_small, bit=8))
    assert y_small.shape == x_small.shape and y_small.dtype == x_small.dtype
    assert bool(jnp.array_equal(y_small, x_small))

    # Larger activation (2 MiB): exercises the pipelined multi-step grid
    # (>= 4 blocks -> DMA overlap; >= 2 parallel steps per v7x TensorCore).
    x_big = jax.random.normal(k2, (8, 64, 32, 32), dtype=jnp.float32)
    y_big = jax.block_until_ready(quantizer_forward(x_big, bit=8))
    assert y_big.shape == x_big.shape and y_big.dtype == x_big.dtype
    assert bool(jnp.array_equal(y_big, x_big))

    print("KERNEL_OK")
</pallas_src>

<mosaic_0001>
module attributes {stable_mosaic.version = 11 : i64} {
  func.func @_quantizer_kernel(%arg0: i32, %arg1: memref<8x256xf32, #tpu.memory_space<vmem>>, %arg2: memref<8x256xf32, #tpu.memory_space<vmem>>) attributes {dimension_semantics = [#tpu.dimension_semantics<parallel>], iteration_bounds = array<i64: 1>, scalar_prefetch = 0 : i64, scratch_operands = 0 : i64, tpu.core_type = #tpu.core_type<tc>, window_params = [{transform_indices = @transform_0, window_bounds = array<i64: 8, 256>}, {transform_indices = @transform_1, window_bounds = array<i64: 8, 256>}]} {
    %c0 = arith.constant 0 : index
    %c0_0 = arith.constant 0 : index
    %0 = vector.load %arg1[%c0, %c0_0] : memref<8x256xf32, #tpu.memory_space<vmem>>, vector<8x256xf32>
    %c0_1 = arith.constant 0 : index
    %c0_2 = arith.constant 0 : index
    %1 = vector.load %arg2[%c0_1, %c0_2] : memref<8x256xf32, #tpu.memory_space<vmem>>, vector<8x256xf32>
    tpu.vector_store %arg2[%c0_1, %c0_2], %0 {strides = array<i32>} : memref<8x256xf32, #tpu.memory_space<vmem>>, vector<8x256xf32>,
    return
  }
  func.func @transform_0(%arg0: i32) -> (i32, i32) {
    %c0_i32 = arith.constant 0 : i32
    %c0_i32_0 = arith.constant 0 : i32
    return %arg0, %c0_i32 : i32, i32
  }
  func.func @transform_1(%arg0: i32) -> (i32, i32) {
    %c0_i32 = arith.constant 0 : i32
    %c0_i32_0 = arith.constant 0 : i32
    return %arg0, %c0_i32 : i32, i32
  }
}

</mosaic_0001>

<bundles_post_ra>
// kernel: tpu_custom_call.1
= control target key start
LH: loop header
LB: loop body
LE: loop exit
PB: predicated region body
PF: predicated region fallthrough
CT: control target
= control target key end

     0   :  { %6 = vsyncpa [#allocation3], 0  ;;  %s116_s0 = inlined_call_operand.hbm [shape: f32[8,256], index: 0, kind: input, shape index: {}, may-alias: {0,1}]   ;;  %s117_s1 = inlined_call_operand.hbm [shape: f32[8,256], index: 1, kind: output, shape index: {}, may-alias: {0,1}]  }
   0x1   :  { %7 = vsyncpa [#allocation4], 0  ;;  %s13_s8 = sshll.u32 %s116_s0, 4  ;;  %s98_s9 = smov [#allocation2]   ;;  %s14_s8 = int_to_ptr.hbm [resolvable:$true] %s13_s8 }
   0x2   :  { %s15_s10 = sshll.u32 %s98_s9, 4  ;;  %s16_s10 = int_to_ptr.vmem [resolvable:$true] %s15_s10 }
   0x3   :  { %18 = dma.hbm_to_vmem [thread:$0]  %s14_s8, 256, %s16_s10, [#allocation3]  }
   0x4   :  { %94 = dma.done.wait [#allocation3], 256  }
   0x5   :  { %95 = vsyncadd [#allocation3], 4294967040  ;;  %s99_s11 = smov [#allocation5]   ;;  %s34_s15 = sshll.u32 %s117_s1, 4  ;;  %v23_v0 = vld [vmem:[#allocation2] sm:$0xff]  ;;  %v24_v1 = vld [vmem:[#allocation2 + $0x8] sm:$0xff]  ;;  %s35_s15 = int_to_ptr.hbm [resolvable:$true] %s34_s15 }
   0x6   :  { %s32_s12 = sshll.u32 %s99_s11, 4  ;;  %25 = vst [vmem:[#allocation5] sm:$0xff] %v23_v0  ;;  %s33_s12 = int_to_ptr.vmem [resolvable:$true] %s32_s12 }
   0x7   :  { %26 = vst [vmem:[#allocation5 + $0x8] sm:$0xff] %v24_v1 }
   0x8   :  { %37 = dma.vmem_to_hbm [thread:$0]  %s33_s12, 256, %s35_s15, [#allocation4]  }
   0x9   :  { %96 = dma.done.wait [#allocation4], 256  }
   0xa   :  { %97 = vsyncadd [#allocation4], 4294967040 }
   0xb   :  { %42 = vsyncpa [#allocation3], 1 }
   0xc   :  { %43 = vsyncpa [#allocation4], 1 }

</bundles_post_ra>
